<compile_context>
chip_gen: v7x
topology: tpu7x:2x2x1
jax: 0.10.0
libtpu: 0.0.40
codegen_flags: <defaults>
</compile_context>

<pallas_src>
import functools

import jax
import jax.numpy as jnp
from jax.experimental import pallas as pl
from jax.experimental.pallas import tpu as pltpu


# ---------------------------------------------------------------------------
# Kernel: fused  linear1 -> relu -> linear2 -> L2 normalize
# ---------------------------------------------------------------------------
def _mlp_embed_kernel(x_ref, w1_ref, b1_ref, w2_ref, b2_ref, o_ref):
    # x tile: (tm, dim_in).  MXU eats bf16 operands; accumulate in f32.
    x = x_ref[...].astype(jnp.bfloat16)

    # linear1 + ReLU
    h = jnp.dot(x, w1_ref[...], preferred_element_type=jnp.float32)
    h = jnp.maximum(h + b1_ref[...], 0.0)                    # (tm, hidden) f32

    # linear2
    y = jnp.dot(h.astype(jnp.bfloat16), w2_ref[...],
                preferred_element_type=jnp.float32)
    y = y + b2_ref[...]                                      # (tm, dim_out) f32

    # Normalize(power=2): y / sqrt(sum(y^2, axis=1)).  (Matches the PyTorch
    # module exactly; an all-zero row would be NaN there too.)
    ssq = jnp.sum(y * y, axis=-1, keepdims=True)
    o_ref[...] = (y * jax.lax.rsqrt(ssq)).astype(o_ref.dtype)


def _round_up(n, m):
    return ((n + m - 1) // m) * m


def _pick_tile(b_aligned, align, block_rows):
    """Largest multiple of `align` that divides b_aligned and is <= block_rows,
    preferring a grid of >= 2 steps (keeps both v7x TensorCores busy)."""
    cap = min(block_rows, b_aligned)
    if b_aligned >= 2 * align:
        cap = min(cap, b_aligned // 2)
    cap = max(align, cap - cap % align)
    for d in range(cap, align - 1, -align):
        if b_aligned % d == 0:
            return d
    return align


# ---------------------------------------------------------------------------
# Wrapper
# ---------------------------------------------------------------------------
@functools.partial(jax.jit, static_argnames=("block_rows",))
def mlp_embed_forward(x, w1, b1, w2, b2, *, block_rows=1024):
    """x: (B, ...) flattened to (B, dim_in).  w1: (dim_in, 2*dim_out),
    b1: (2*dim_out,), w2: (2*dim_out, dim_out), b2: (dim_out,)."""
    B = x.shape[0]
    x2 = x.reshape(B, -1)
    # Stream x in its native precision when it is already f32/bf16 -- avoids
    # an extra full read+write pass over x outside the kernel.
    if x2.dtype not in (jnp.float32, jnp.bfloat16):
        x2 = x2.astype(jnp.float32)

    dim_in = x2.shape[1]
    hidden = w1.shape[1]
    dim_out = w2.shape[1]
    assert w1.shape == (dim_in, hidden)
    assert w2.shape == (hidden, dim_out)
    assert dim_in % 128 == 0 and hidden % 128 == 0 and dim_out % 128 == 0, (
        "feature dims must be multiples of 128 for lane-dense tiling")

    # Sublane alignment: 8 rows for f32, 16 for bf16 (sublane packing).
    align = 16 if x2.dtype == jnp.bfloat16 else 8
    b_pad = _round_up(B, align)
    if b_pad != B:  # only copies when B is not already sublane-aligned
        x2 = jnp.pad(x2, ((0, b_pad - B), (0, 0)))

    tm = _pick_tile(b_pad, align, block_rows)
    grid = b_pad // tm

    # Weights are tiny; keep them VMEM-resident in bf16 (feeds MXU directly).
    w1b = w1.astype(jnp.bfloat16)
    w2b = w2.astype(jnp.bfloat16)
    b1_2d = b1.reshape(1, hidden).astype(jnp.float32)
    b2_2d = b2.reshape(1, dim_out).astype(jnp.float32)

    out = pl.pallas_call(
        _mlp_embed_kernel,
        out_shape=jax.ShapeDtypeStruct((b_pad, dim_out), jnp.float32),
        grid_spec=pltpu.PrefetchScalarGridSpec(
            num_scalar_prefetch=0,
            grid=(grid,),
            in_specs=[
                pl.BlockSpec((tm, dim_in), lambda i: (i, 0)),       # x tile
                pl.BlockSpec((dim_in, hidden), lambda i: (0, 0)),   # W1 (resident)
                pl.BlockSpec((1, hidden), lambda i: (0, 0)),        # b1
                pl.BlockSpec((hidden, dim_out), lambda i: (0, 0)),  # W2 (resident)
                pl.BlockSpec((1, dim_out), lambda i: (0, 0)),       # b2
            ],
            out_specs=pl.BlockSpec((tm, dim_out), lambda i: (i, 0)),
        ),
        compiler_params=pltpu.CompilerParams(
            dimension_semantics=("parallel",),
            vmem_limit_bytes=32 * 1024 * 1024),
    )(x2, w1b, b1_2d, w2b, b2_2d)

    if b_pad != B:
        out = out[:B]
    return out


class MLPEmbed:
    """Stateful wrapper mirroring the PyTorch MLPEmbed (forward path only).

    Weights are stored as (in, out) so the kernel computes x @ W + b, which
    is equivalent to PyTorch's x @ W_pt.T + b.
    """

    def __init__(self, dim_in=1024, dim_out=128, *, key):
        k1, k2, k3, k4 = jax.random.split(key, 4)
        hidden = 2 * dim_out
        bound1 = 1.0 / (dim_in ** 0.5)
        bound2 = 1.0 / (hidden ** 0.5)
        self.w1 = jax.random.uniform(k1, (dim_in, hidden), jnp.float32,
                                     -bound1, bound1)
        self.b1 = jax.random.uniform(k2, (hidden,), jnp.float32,
                                     -bound1, bound1)
        self.w2 = jax.random.uniform(k3, (hidden, dim_out), jnp.float32,
                                     -bound2, bound2)
        self.b2 = jax.random.uniform(k4, (dim_out,), jnp.float32,
                                     -bound2, bound2)
        # TODO(synk): self.regressor exists in the PyTorch module but is
        # unused by forward(); it is intentionally not implemented here.

    def __call__(self, x):
        return mlp_embed_forward(x, self.w1, self.b1, self.w2, self.b2)


# ---------------------------------------------------------------------------
# Pure-JAX reference for correctness checking
# ---------------------------------------------------------------------------
def _mlp_embed_ref(x, w1, b1, w2, b2):
    x2 = x.reshape(x.shape[0], -1).astype(jnp.float32)
    h = jnp.maximum(x2 @ w1 + b1, 0.0)
    y = h @ w2 + b2
    norm = jnp.sqrt(jnp.sum(y * y, axis=1, keepdims=True))
    return y / norm


# ---------------------------------------------------------------------------
# Demo / self-test
# ---------------------------------------------------------------------------
if __name__ == "__main__":
    key = jax.random.PRNGKey(0)
    kx, kp = jax.random.split(key)

    layer = MLPEmbed(dim_in=1024, dim_out=128, key=kp)

    # bf16 MXU operands vs f32 reference -> ~1e-2 relative error expected.
    tol = dict(atol=3e-2, rtol=3e-2)

    # 1) NCHW f32 input: (2, 4, 16, 16) -> dim_in = 4*16*16 = 1024.
    x = jax.random.normal(kx, (2, 4, 16, 16), dtype=jnp.float32)
    out = jax.block_until_ready(layer(x))
    assert out.shape == (2, 128) and out.dtype == jnp.float32
    ref = _mlp_embed_ref(x, layer.w1, layer.b1, layer.w2, layer.b2)
    assert jnp.allclose(out, ref, **tol), (
        "Pallas MLPEmbed mismatch vs JAX reference: "
        f"max abs err {jnp.max(jnp.abs(out - ref))}")
    row_norms = jnp.sqrt(jnp.sum(out * out, axis=1))
    assert jnp.allclose(row_norms, 1.0, atol=1e-4)

    # 2) Larger flat batch -> exercises a multi-step grid over the batch axis.
    x_big = jax.random.normal(jax.random.PRNGKey(1), (48, 1024), jnp.float32)
    out_big = jax.block_until_ready(layer(x_big))
    ref_big = _mlp_embed_ref(x_big, layer.w1, layer.b1, layer.w2, layer.b2)
    assert out_big.shape == (48, 128)
    assert jnp.allclose(out_big, ref_big, **tol)

    # 3) bf16 input path (halved HBM stream, 16-row sublane alignment).
    x_bf = x.astype(jnp.bfloat16)
    out_bf = jax.block_until_ready(layer(x_bf))
    ref_bf = _mlp_embed_ref(x_bf, layer.w1, layer.b1, layer.w2, layer.b2)
    assert jnp.allclose(out_bf, ref_bf, **tol)

    print("KERNEL_OK")
</pallas_src>

<mosaic_0001>
module attributes {stable_mosaic.version = 11 : i64} {
  func.func @_mlp_embed_kernel(%arg0: i32, %arg1: memref<8x1024xf32, #tpu.memory_space<vmem>>, %arg2: memref<1024x256xbf16, #tpu.memory_space<vmem>>, %arg3: memref<1x256xf32, #tpu.memory_space<vmem>>, %arg4: memref<256x128xbf16, #tpu.memory_space<vmem>>, %arg5: memref<1x128xf32, #tpu.memory_space<vmem>>, %arg6: memref<8x128xf32, #tpu.memory_space<vmem>>) attributes {dimension_semantics = [#tpu.dimension_semantics<parallel>], iteration_bounds = array<i64: 1>, scalar_prefetch = 0 : i64, scratch_operands = 0 : i64, tpu.core_type = #tpu.core_type<tc>, window_params = [{transform_indices = @transform_0, window_bounds = array<i64: 8, 1024>}, {pipeline_mode = #tpu.pipeline_mode<synchronous>, transform_indices = @transform_1, window_bounds = array<i64: 1024, 256>}, {pipeline_mode = #tpu.pipeline_mode<synchronous>, transform_indices = @transform_2, window_bounds = array<i64: 1, 256>}, {pipeline_mode = #tpu.pipeline_mode<synchronous>, transform_indices = @transform_3, window_bounds = array<i64: 256, 128>}, {pipeline_mode = #tpu.pipeline_mode<synchronous>, transform_indices = @transform_4, window_bounds = array<i64: 1, 128>}, {transform_indices = @transform_5, window_bounds = array<i64: 8, 128>}]} {
    %c0 = arith.constant 0 : index
    %c0_0 = arith.constant 0 : index
    %0 = vector.load %arg1[%c0, %c0_0] : memref<8x1024xf32, #tpu.memory_space<vmem>>, vector<8x1024xf32>
    %1 = arith.truncf %0 : vector<8x1024xf32> to vector<8x1024xbf16>
    %c0_1 = arith.constant 0 : index
    %c0_2 = arith.constant 0 : index
    %2 = vector.load %arg2[%c0_1, %c0_2] : memref<1024x256xbf16, #tpu.memory_space<vmem>>, vector<1024x256xbf16>
    %cst = arith.constant dense<0.000000e+00> : vector<8x256xf32>
    %3 = tpu.matmul %1, %2, %cst {dimension_numbers = #tpu.dot_dimension_numbers<[1], [0], [0], [1], [0, 0, 1, 1], [], []>} : vector<8x1024xbf16>, vector<1024x256xbf16>, vector<8x256xf32> -> vector<8x256xf32>
    %c0_3 = arith.constant 0 : index
    %c0_4 = arith.constant 0 : index
    %4 = vector.load %arg3[%c0_3, %c0_4] : memref<1x256xf32, #tpu.memory_space<vmem>>, vector<1x256xf32>
    %5 = vector.broadcast %4 : vector<1x256xf32> to vector<8x256xf32>
    %6 = arith.addf %3, %5 : vector<8x256xf32>
    %cst_5 = arith.constant 0.000000e+00 : f32
    %7 = vector.broadcast %cst_5 : f32 to vector<8x256xf32>
    %8 = arith.maximumf %6, %7 : vector<8x256xf32>
    %9 = arith.truncf %8 : vector<8x256xf32> to vector<8x256xbf16>
    %c0_6 = arith.constant 0 : index
    %c0_7 = arith.constant 0 : index
    %10 = vector.load %arg4[%c0_6, %c0_7] : memref<256x128xbf16, #tpu.memory_space<vmem>>, vector<256x128xbf16>
    %cst_8 = arith.constant dense<0.000000e+00> : vector<8x128xf32>
    %11 = tpu.matmul %9, %10, %cst_8 {dimension_numbers = #tpu.dot_dimension_numbers<[1], [0], [0], [1], [0, 0, 1, 1], [], []>} : vector<8x256xbf16>, vector<256x128xbf16>, vector<8x128xf32> -> vector<8x128xf32>
    %c0_9 = arith.constant 0 : index
    %c0_10 = arith.constant 0 : index
    %12 = vector.load %arg5[%c0_9, %c0_10] : memref<1x128xf32, #tpu.memory_space<vmem>>, vector<1x128xf32>
    %13 = vector.broadcast %12 : vector<1x128xf32> to vector<8x128xf32>
    %14 = arith.addf %11, %13 : vector<8x128xf32>
    %15 = arith.mulf %14, %14 : vector<8x128xf32>
    %cst_11 = arith.constant dense<0.000000e+00> : vector<8xf32>
    %16 = vector.multi_reduction <add>, %15, %cst_11 [1] : vector<8x128xf32> to vector<8xf32>
    %17 = vector.shape_cast %16 : vector<8xf32> to vector<8x1xf32>
    %18 = math.rsqrt %17 : vector<8x1xf32>
    %19 = vector.broadcast %18 : vector<8x1xf32> to vector<8x128xf32>
    %20 = arith.mulf %14, %19 : vector<8x128xf32>
    %c0_12 = arith.constant 0 : index
    %c0_13 = arith.constant 0 : index
    %21 = vector.load %arg6[%c0_12, %c0_13] : memref<8x128xf32, #tpu.memory_space<vmem>>, vector<8x128xf32>
    tpu.vector_store %arg6[%c0_12, %c0_13], %20 {strides = array<i32>} : memref<8x128xf32, #tpu.memory_space<vmem>>, vector<8x128xf32>,
    return
  }
  func.func @transform_0(%arg0: i32) -> (i32, i32) {
    %c0_i32 = arith.constant 0 : i32
    %c0_i32_0 = arith.constant 0 : i32
    return %arg0, %c0_i32 : i32, i32
  }
  func.func @transform_1(%arg0: i32) -> (i32, i32) {
    %c0_i32 = arith.constant 0 : i32
    %c0_i32_0 = arith.constant 0 : i32
    %c0_i32_1 = arith.constant 0 : i32
    return %c0_i32, %c0_i32_0 : i32, i32
  }
  func.func @transform_2(%arg0: i32) -> (i32, i32) {
    %c0_i32 = arith.constant 0 : i32
    %c0_i32_0 = arith.constant 0 : i32
    %c0_i32_1 = arith.constant 0 : i32
    return %c0_i32, %c0_i32_0 : i32, i32
  }
  func.func @transform_3(%arg0: i32) -> (i32, i32) {
    %c0_i32 = arith.constant 0 : i32
    %c0_i32_0 = arith.constant 0 : i32
    %c0_i32_1 = arith.constant 0 : i32
    return %c0_i32, %c0_i32_0 : i32, i32
  }
  func.func @transform_4(%arg0: i32) -> (i32, i32) {
    %c0_i32 = arith.constant 0 : i32
    %c0_i32_0 = arith.constant 0 : i32
    %c0_i32_1 = arith.constant 0 : i32
    return %c0_i32, %c0_i32_0 : i32, i32
  }
  func.func @transform_5(%arg0: i32) -> (i32, i32) {
    %c0_i32 = arith.constant 0 : i32
    %c0_i32_0 = arith.constant 0 : i32
    return %arg0, %c0_i32 : i32, i32
  }
}

</mosaic_0001>

<bundles_post_ra>
// kernel: mlp_embed_forward.1
= control target key start
LH: loop header
LB: loop body
LE: loop exit
PB: predicated region body
PF: predicated region fallthrough
CT: control target
= control target key end

     0   :  { %s2054_s1 = inlined_call_operand.vmem [shape: bf16[1024,256], index: 1, kind: input, shape index: {}]   ;;  %s2055_s0 = inlined_call_operand.vmem [shape: f32[8,1024], index: 0, kind: input, shape index: {}]   ;;  %s2056_s3 = inlined_call_operand.vmem [shape: bf16[256,128], index: 3, kind: input, shape index: {}]   ;;  %s2057_s2 = inlined_call_operand.vmem [shape: f32[1,256], index: 2, kind: input, shape index: {}]   ;;  %s2058_s4 = inlined_call_operand.vmem [shape: f32[1,128], index: 4, kind: input, shape index: {}]   ;;  %s2059_s5 = inlined_call_operand.vmem [shape: f32[8,128], index: 5, kind: output, shape index: {}]  }
   0x1   :  { %v1349_v0 = vld [vmem:[%s2054_s1 + $0x4] ss:$8 sps:$4 sm:$0xff]   ;;  %v1353_v2 = vld [vmem:[%s2054_s1] ss:$8 sps:$4 sm:$0xff]   ;;  %v1355_v4 = vld [vmem:[%s2054_s1 + $0x14] ss:$8 sps:$4 sm:$0xff]  }
   0x2   :  { %v1351_v1 = vld [vmem:[%s2054_s1 + $0x204] ss:$8 sps:$4 sm:$0xff]   ;;  %817 = vmatprep.subr.bf16.mxu1 %v1349_v0  ;;  %v1354_v3 = vld [vmem:[%s2054_s1 + $0x200] ss:$8 sps:$4 sm:$0xff]   ;;  %v1357_v5 = vld [vmem:[%s2054_s1 + $0x214] ss:$8 sps:$4 sm:$0xff]  }
   0x3   :  { %899 = vmatprep.subr.bf16.mxu0 %v1351_v1  ;;  %818 = vmatpush1.bf16.msra.mxu1 %v1353_v2  ;;  %v1359_v6 = vld [vmem:[%s2054_s1 + $0x10] ss:$8 sps:$4 sm:$0xff]   ;;  %v1361_v8 = vld [vmem:[%s2054_s1 + $0x24] ss:$8 sps:$4 sm:$0xff]   ;;  %v1365_v10 = vld [vmem:[%s2054_s1 + $0x20] ss:$8 sps:$4 sm:$0xff]  }
   0x4   :  { %900 = vmatpush1.bf16.msra.mxu0 %v1354_v3  ;;  %819 = vmatprep.subr.bf16.mxu1 %v1355_v4  ;;  %v1360_v7 = vld [vmem:[%s2054_s1 + $0x210] ss:$8 sps:$4 sm:$0xff]   ;;  %v1363_v9 = vld [vmem:[%s2054_s1 + $0x224] ss:$8 sps:$4 sm:$0xff]   ;;  %v1366_v11 = vld [vmem:[%s2054_s1 + $0x220] ss:$8 sps:$4 sm:$0xff]  }
   0x5   :  { %901 = vmatprep.subr.bf16.mxu0 %v1357_v5  ;;  %v1367_v12 = vld [vmem:[%s2054_s1 + $0x34] ss:$8 sps:$4 sm:$0xff]   ;;  %v1371_v14 = vld [vmem:[%s2054_s1 + $0x30] ss:$8 sps:$4 sm:$0xff]   ;;  %v1373_v16 = vld [vmem:[%s2054_s1 + $0x44] ss:$8 sps:$4 sm:$0xff]  }
   0x6   :  { %v1369_v13 = vld [vmem:[%s2054_s1 + $0x234] ss:$8 sps:$4 sm:$0xff]   ;;  %v1372_v15 = vld [vmem:[%s2054_s1 + $0x230] ss:$8 sps:$4 sm:$0xff]   ;;  %v1375_v17 = vld [vmem:[%s2054_s1 + $0x244] ss:$8 sps:$4 sm:$0xff]  }
   0x7   :  { %820 = vmatpush1.bf16.msra.mxu1 %v1359_v6  ;;  %v1377_v18 = vld [vmem:[%s2054_s1 + $0x40] ss:$8 sps:$4 sm:$0xff]   ;;  %v1379_v20 = vld [vmem:[%s2054_s1 + $0x54] ss:$8 sps:$4 sm:$0xff]   ;;  %v1383_v22 = vld [vmem:[%s2054_s1 + $0x50] ss:$8 sps:$4 sm:$0xff]  }
   0x8   :  { %902 = vmatpush1.bf16.msra.mxu0 %v1360_v7  ;;  %821 = vmatprep.subr.bf16.mxu1 %v1361_v8  ;;  %v1378_v19 = vld [vmem:[%s2054_s1 + $0x240] ss:$8 sps:$4 sm:$0xff]   ;;  %v1381_v21 = vld [vmem:[%s2054_s1 + $0x254] ss:$8 sps:$4 sm:$0xff]   ;;  %v1384_v23 = vld [vmem:[%s2054_s1 + $0x250] ss:$8 sps:$4 sm:$0xff]  }
   0x9   :  { %903 = vmatprep.subr.bf16.mxu0 %v1363_v9  ;;  %v1385_v24 = vld [vmem:[%s2054_s1 + $0x64] ss:$8 sps:$4 sm:$0xff]   ;;  %v1389_v26 = vld [vmem:[%s2054_s1 + $0x60] ss:$8 sps:$4 sm:$0xff]   ;;  %v1391_v28 = vld [vmem:[%s2054_s1 + $0x74] ss:$8 sps:$4 sm:$0xff]  }
   0xa   :  { %v1387_v25 = vld [vmem:[%s2054_s1 + $0x264] ss:$8 sps:$4 sm:$0xff]   ;;  %v1390_v27 = vld [vmem:[%s2054_s1 + $0x260] ss:$8 sps:$4 sm:$0xff]   ;;  %v1393_v29 = vld [vmem:[%s2054_s1 + $0x274] ss:$8 sps:$4 sm:$0xff]  }
   0xb   :  { %822 = vmatpush1.bf16.msra.mxu1 %v1365_v10  ;;  %v1395_v30 = vld [vmem:[%s2054_s1 + $0x70] ss:$8 sps:$4 sm:$0xff]   ;;  %v1397_v32 = vld [vmem:[%s2054_s1 + $0x84] ss:$8 sps:$4 sm:$0xff]   ;;  %v1401_v34 = vld [vmem:[%s2054_s1 + $0x80] ss:$8 sps:$4 sm:$0xff]  }
   0xc   :  { %904 = vmatpush1.bf16.msra.mxu0 %v1366_v11  ;;  %823 = vmatprep.subr.bf16.mxu1 %v1367_v12  ;;  %v1396_v31 = vld [vmem:[%s2054_s1 + $0x270] ss:$8 sps:$4 sm:$0xff]   ;;  %v1399_v33 = vld [vmem:[%s2054_s1 + $0x284] ss:$8 sps:$4 sm:$0xff]   ;;  %v1402_v35 = vld [vmem:[%s2054_s1 + $0x280] ss:$8 sps:$4 sm:$0xff]  }
   0xd   :  { %905 = vmatprep.subr.bf16.mxu0 %v1369_v13  ;;  %v1403_v36 = vld [vmem:[%s2054_s1 + $0x94] ss:$8 sps:$4 sm:$0xff]   ;;  %v1407_v38 = vld [vmem:[%s2054_s1 + $0x90] ss:$8 sps:$4 sm:$0xff]   ;;  %v1409_v40 = vld [vmem:[%s2054_s1 + $0xa4] ss:$8 sps:$4 sm:$0xff]  }
   0xe   :  { %v1405_v37 = vld [vmem:[%s2054_s1 + $0x294] ss:$8 sps:$4 sm:$0xff]   ;;  %v1408_v39 = vld [vmem:[%s2054_s1 + $0x290] ss:$8 sps:$4 sm:$0xff]   ;;  %v1411_v41 = vld [vmem:[%s2054_s1 + $0x2a4] ss:$8 sps:$4 sm:$0xff]  }
   0xf   :  { %824 = vmatpush1.bf16.msra.mxu1 %v1371_v14  ;;  %v1413_v42 = vld [vmem:[%s2054_s1 + $0xa0] ss:$8 sps:$4 sm:$0xff]   ;;  %v1415_v44 = vld [vmem:[%s2054_s1 + $0xb4] ss:$8 sps:$4 sm:$0xff]   ;;  %v1419_v47 = vld [vmem:[%s2054_s1 + $0xb0] ss:$8 sps:$4 sm:$0xff]  }
  0x10   :  { %906 = vmatpush1.bf16.msra.mxu0 %v1372_v15  ;;  %825 = vmatprep.subr.bf16.mxu1 %v1373_v16  ;;  %v1414_v43 = vld [vmem:[%s2054_s1 + $0x2a0] ss:$8 sps:$4 sm:$0xff]   ;;  %v1417_v45 = vld [vmem:[%s2054_s1 + $0x2b4] ss:$8 sps:$4 sm:$0xff]   ;;  %v1420_v49 = vld [vmem:[%s2054_s1 + $0x2b0] ss:$8 sps:$4 sm:$0xff]  }
  0x11   :  { %907 = vmatprep.subr.bf16.mxu0 %v1375_v17  ;;  %v22_v46 = vld [vmem:[%s2055_s0 + $0x8] sm:$0xff]  ;;  %v1427_v56 = vld [vmem:[%s2054_s1 + $0xd4] ss:$8 sps:$4 sm:$0xff]   ;;  %v1431_v58 = vld [vmem:[%s2054_s1 + $0xd0] ss:$8 sps:$4 sm:$0xff]  }
  0x12   :  { %v30_v48 = vpack.c.bf16 %v22_v46, %v22_v46  ;;  %v26_v50 = vld [vmem:[%s2055_s0 + $0x28] sm:$0xff]  ;;  %v1429_v57 = vld [vmem:[%s2054_s1 + $0x2d4] ss:$8 sps:$4 sm:$0xff]   ;;  %v1432_v59 = vld [vmem:[%s2054_s1 + $0x2d0] ss:$8 sps:$4 sm:$0xff]  }
  0x13   :  { %826 = vmatpush1.bf16.msra.mxu1 %v1377_v18  ;;  %v1421_v51 = vld [vmem:[%s2054_s1 + $0xc4] ss:$8 sps:$4 sm:$0xff]   ;;  %v34_v53 = vpack.c.bf16 %v26_v50, %v26_v50  ;;  %v1425_v54 = vld [vmem:[%s2054_s1 + $0xc0] ss:$8 sps:$4 sm:$0xff]   ;;  %v1439_v0 = vld [vmem:[%s2054_s1 + $0xf4] ss:$8 sps:$4 sm:$0xff]  }
  0x14   :  { %908 = vmatpush1.bf16.msra.mxu0 %v1378_v19  ;;  %827 = vmatprep.subr.bf16.mxu1 %v1379_v20  ;;  %v1423_v52 = vld [vmem:[%s2054_s1 + $0x2c4] ss:$8 sps:$4 sm:$0xff]   ;;  %v1426_v55 = vld [vmem:[%s2054_s1 + $0x2c0] ss:$8 sps:$4 sm:$0xff]   ;;  %v1441_v1 = vld [vmem:[%s2054_s1 + $0x2f4] ss:$8 sps:$4 sm:$0xff]  }
  0x15   :  { %909 = vmatprep.subr.bf16.mxu0 %v1381_v21  ;;  %849 = vmatprep.mubr.bf16.mxu1 %v30_v48  ;;  %v1433_v60 = vld [vmem:[%s2054_s1 + $0xe4] ss:$8 sps:$4 sm:$0xff]   ;;  %v1437_v62 = vld [vmem:[%s2054_s1 + $0xe0] ss:$8 sps:$4 sm:$0xff]   ;;  %v1443_v2 = vld [vmem:[%s2054_s1 + $0xf0] ss:$8 sps:$4 sm:$0xff]  }
  0x16   :  { %931 = vmatprep.mubr.bf16.mxu0 %v34_v53  ;;  %v1435_v61 = vld [vmem:[%s2054_s1 + $0x2e4] ss:$8 sps:$4 sm:$0xff]   ;;  %v1438_v63 = vld [vmem:[%s2054_s1 + $0x2e0] ss:$8 sps:$4 sm:$0xff]   ;;  %v1444_v3 = vld [vmem:[%s2054_s1 + $0x2f0] ss:$8 sps:$4 sm:$0xff]  }
  0x17   :  { %828 = vmatpush1.bf16.msra.mxu1 %v1383_v22  ;;  %v1447_v4 = vld [vmem:[%s2054_s1 + $0x104] ss:$8 sps:$4 sm:$0xff]   ;;  %v1445_v8 = vld [vmem:[%s2054_s1 + $0x100] ss:$8 sps:$4 sm:$0xff]   ;;  %v1453_v12 = vld [vmem:[%s2054_s1 + $0x114] ss:$8 sps:$4 sm:$0xff]  }
  0x18   :  { %910 = vmatpush1.bf16.msra.mxu0 %v1384_v23  ;;  %829 = vmatprep.subr.bf16.mxu1 %v1385_v24  ;;  %v21_v5 = vld [vmem:[%s2055_s0] sm:$0xff]  ;;  %v1456_v13 = vld [vmem:[%s2054_s1 + $0x314] ss:$8 sps:$4 sm:$0xff]   ;;  %v1451_v14 = vld [vmem:[%s2054_s1 + $0x110] ss:$8 sps:$4 sm:$0xff]  }
  0x19   :  { %911 = vmatprep.subr.bf16.mxu0 %v1387_v25  ;;  %v25_v6 = vld [vmem:[%s2055_s0 + $0x20] sm:$0xff]  ;;  %v29_v10 = vpack.c.bf16 %v21_v5, %v21_v5  ;;  %v1454_v15 = vld [vmem:[%s2054_s1 + $0x310] ss:$8 sps:$4 sm:$0xff]   ;;  %v1465_v20 = vld [vmem:[%s2054_s1 + $0x134] ss:$8 sps:$4 sm:$0xff]  }
  0x1a   :  { %v1450_v7 = vld [vmem:[%s2054_s1 + $0x304] ss:$8 sps:$4 sm:$0xff]   ;;  %v1448_v9 = vld [vmem:[%s2054_s1 + $0x300] ss:$8 sps:$4 sm:$0xff]   ;;  %v33_v11 = vpack.c.bf16 %v25_v6, %v25_v6  ;;  %v1468_v21 = vld [vmem:[%s2054_s1 + $0x334] ss:$8 sps:$4 sm:$0xff]  }
  0x1b   :  { %830 = vmatpush1.bf16.msra.mxu1 %v1389_v26  ;;  %v1459_v16 = vld [vmem:[%s2054_s1 + $0x124] ss:$8 sps:$4 sm:$0xff]   ;;  %v1457_v18 = vld [vmem:[%s2054_s1 + $0x120] ss:$8 sps:$4 sm:$0xff]   ;;  %v1463_v22 = vld [vmem:[%s2054_s1 + $0x130] ss:$8 sps:$4 sm:$0xff]  }
  0x1c   :  { %912 = vmatpush1.bf16.msra.mxu0 %v1390_v27  ;;  %831 = vmatprep.subr.bf16.mxu1 %v1391_v28  ;;  %v1462_v17 = vld [vmem:[%s2054_s1 + $0x324] ss:$8 sps:$4 sm:$0xff]   ;;  %v1460_v19 = vld [vmem:[%s2054_s1 + $0x320] ss:$8 sps:$4 sm:$0xff]   ;;  %v1466_v23 = vld [vmem:[%s2054_s1 + $0x330] ss:$8 sps:$4 sm:$0xff]  }
  0x1d   :  { %913 = vmatprep.subr.bf16.mxu0 %v1393_v29  ;;  %v1471_v24 = vld [vmem:[%s2054_s1 + $0x144] ss:$8 sps:$4 sm:$0xff]   ;;  %v1469_v26 = vld [vmem:[%s2054_s1 + $0x140] ss:$8 sps:$4 sm:$0xff]   ;;  %v1477_v28 = vld [vmem:[%s2054_s1 + $0x154] ss:$8 sps:$4 sm:$0xff]  }
  0x1e   :  { %v1474_v25 = vld [vmem:[%s2054_s1 + $0x344] ss:$8 sps:$4 sm:$0xff]   ;;  %v1472_v27 = vld [vmem:[%s2054_s1 + $0x340] ss:$8 sps:$4 sm:$0xff]   ;;  %v1480_v29 = vld [vmem:[%s2054_s1 + $0x354] ss:$8 sps:$4 sm:$0xff]  }
  0x1f   :  { %832 = vmatpush1.bf16.msra.mxu1 %v1395_v30  ;;  %v1475_v30 = vld [vmem:[%s2054_s1 + $0x150] ss:$8 sps:$4 sm:$0xff]   ;;  %v1493_v46 = vld [vmem:[%s2054_s1 + $0x180] ss:$8 sps:$4 sm:$0xff]   ;;  %v1501_v48 = vld [vmem:[%s2054_s1 + $0x194] ss:$8 sps:$4 sm:$0xff]  }
  0x20   :  { %914 = vmatpush1.bf16.msra.mxu0 %v1396_v31  ;;  %833 = vmatprep.subr.bf16.mxu1 %v1397_v32  ;;  %v1478_v31 = vld [vmem:[%s2054_s1 + $0x350] ss:$8 sps:$4 sm:$0xff]   ;;  %v1483_v32 = vld [vmem:[%s2054_s1 + $0x164] ss:$8 sps:$4 sm:$0xff]   ;;  %v1529_v6 = vld [vmem:[%s2054_s1 + $0x1e0] ss:$8 sps:$4 sm:$0xff]  }
  0x21   :  { %915 = vmatprep.subr.bf16.mxu0 %v1399_v33  ;;  %v1486_v33 = vld [vmem:[%s2054_s1 + $0x364] ss:$8 sps:$4 sm:$0xff]   ;;  %v1499_v50 = vld [vmem:[%s2054_s1 + $0x190] ss:$8 sps:$4 sm:$0xff]  }
  0x22   :  { %v1510_v53 = vld [vmem:[%s2054_s1 + $0x3a4] ss:$8 sps:$4 sm:$0xff]  }
  0x23   :  { %834 = vmatpush1.bf16.msra.mxu1 %v1401_v34  ;;  %v24_v34 = vld [vmem:[%s2055_s0 + $0x18] sm:$0xff]  ;;  %v1534_v5 = vld [vmem:[%s2054_s1 + $0x3e4] ss:$8 sps:$4 sm:$0xff]  }
  0x24   :  { %916 = vmatpush1.bf16.msra.mxu0 %v1402_v35  ;;  %835 = vmatprep.subr.bf16.mxu1 %v1403_v36  ;;  %v1481_v35 = vld [vmem:[%s2054_s1 + $0x160] ss:$8 sps:$4 sm:$0xff]  }
  0x25   :  { %917 = vmatprep.subr.bf16.mxu0 %v1405_v37  ;;  %v1484_v36 = vld [vmem:[%s2054_s1 + $0x360] ss:$8 sps:$4 sm:$0xff]   ;;  %v32_v37 = vpack.c.bf16 %v24_v34, %v24_v34 }
  0x27   :  { %836 = vmatpush1.bf16.msra.mxu1 %v1407_v38  ;;  %v28_v38 = vld [vmem:[%s2055_s0 + $0x38] sm:$0xff] }
  0x28   :  { %918 = vmatpush1.bf16.msra.mxu0 %v1408_v39  ;;  %837 = vmatprep.subr.bf16.mxu1 %v1409_v40  ;;  %v1489_v39 = vld [vmem:[%s2054_s1 + $0x174] ss:$8 sps:$4 sm:$0xff]   ;;  %v36_v40 = vpack.c.bf16 %v28_v38, %v28_v38 }
  0x29   :  { %919 = vmatprep.subr.bf16.mxu0 %v1411_v41  ;;  %v1492_v41 = vld [vmem:[%s2054_s1 + $0x374] ss:$8 sps:$4 sm:$0xff]  }
  0x2b   :  { %838 = vmatpush1.bf16.msra.mxu1 %v1413_v42  ;;  %v1487_v42 = vld [vmem:[%s2054_s1 + $0x170] ss:$8 sps:$4 sm:$0xff]  }
  0x2c   :  { %920 = vmatpush1.bf16.msra.mxu0 %v1414_v43  ;;  %839 = vmatprep.subr.bf16.mxu1 %v1415_v44  ;;  %v1490_v43 = vld [vmem:[%s2054_s1 + $0x370] ss:$8 sps:$4 sm:$0xff]   ;;  %v1495_v44 = vld [vmem:[%s2054_s1 + $0x184] ss:$8 sps:$4 sm:$0xff]  }
  0x2d   :  { %921 = vmatprep.subr.bf16.mxu0 %v1417_v45  ;;  %v1498_v45 = vld [vmem:[%s2054_s1 + $0x384] ss:$8 sps:$4 sm:$0xff]  }
  0x2f   :  { %840 = vmatpush1.bf16.msra.mxu1 %v1419_v47  ;;  %v1496_v47 = vld [vmem:[%s2054_s1 + $0x380] ss:$8 sps:$4 sm:$0xff]  }
  0x30   :  { %922 = vmatpush1.bf16.msra.mxu0 %v1420_v49  ;;  %841 = vmatprep.subr.bf16.mxu1 %v1421_v51  ;;  %v1504_v49 = vld [vmem:[%s2054_s1 + $0x394] ss:$8 sps:$4 sm:$0xff]   ;;  %v1502_v51 = vld [vmem:[%s2054_s1 + $0x390] ss:$8 sps:$4 sm:$0xff]  }
  0x31   :  { %923 = vmatprep.subr.bf16.mxu0 %v1423_v52  ;;  %v1507_v52 = vld [vmem:[%s2054_s1 + $0x1a4] ss:$8 sps:$4 sm:$0xff]  }
  0x33   :  { %842 = vmatpush1.bf16.msra.mxu1 %v1425_v54  ;;  %v1505_v54 = vld [vmem:[%s2054_s1 + $0x1a0] ss:$8 sps:$4 sm:$0xff]  }
  0x34   :  { %924 = vmatpush1.bf16.msra.mxu0 %v1426_v55  ;;  %843 = vmatprep.subr.bf16.mxu1 %v1427_v56  ;;  %v1508_v55 = vld [vmem:[%s2054_s1 + $0x3a0] ss:$8 sps:$4 sm:$0xff]   ;;  %v1513_v56 = vld [vmem:[%s2054_s1 + $0x1b4] ss:$8 sps:$4 sm:$0xff]  }
  0x35   :  { %925 = vmatprep.subr.bf16.mxu0 %v1429_v57  ;;  %v1516_v57 = vld [vmem:[%s2054_s1 + $0x3b4] ss:$8 sps:$4 sm:$0xff]  }
  0x37   :  { %844 = vmatpush1.bf16.msra.mxu1 %v1431_v58  ;;  %v1511_v58 = vld [vmem:[%s2054_s1 + $0x1b0] ss:$8 sps:$4 sm:$0xff]  }
  0x38   :  { %926 = vmatpush1.bf16.msra.mxu0 %v1432_v59  ;;  %845 = vmatprep.subr.bf16.mxu1 %v1433_v60  ;;  %v1514_v59 = vld [vmem:[%s2054_s1 + $0x3b0] ss:$8 sps:$4 sm:$0xff]   ;;  %v1519_v60 = vld [vmem:[%s2054_s1 + $0x1c4] ss:$8 sps:$4 sm:$0xff]  }
  0x39   :  { %927 = vmatprep.subr.bf16.mxu0 %v1435_v61  ;;  %v1522_v61 = vld [vmem:[%s2054_s1 + $0x3c4] ss:$8 sps:$4 sm:$0xff]  }
  0x3b   :  { %846 = vmatpush1.bf16.msra.mxu1 %v1437_v62  ;;  %v1517_v62 = vld [vmem:[%s2054_s1 + $0x1c0] ss:$8 sps:$4 sm:$0xff]  }
  0x3c   :  { %928 = vmatpush1.bf16.msra.mxu0 %v1438_v63  ;;  %847 = vmatprep.subr.bf16.mxu1 %v1439_v0  ;;  %v1520_v63 = vld [vmem:[%s2054_s1 + $0x3c0] ss:$8 sps:$4 sm:$0xff]   ;;  %v1525_v0 = vld [vmem:[%s2054_s1 + $0x1d4] ss:$8 sps:$4 sm:$0xff]  }
  0x3d   :  { %929 = vmatprep.subr.bf16.mxu0 %v1441_v1  ;;  %v1528_v1 = vld [vmem:[%s2054_s1 + $0x3d4] ss:$8 sps:$4 sm:$0xff]  }
  0x3f   :  { %848 = vmatpush1.bf16.msra.mxu1 %v1443_v2  ;;  %v1523_v2 = vld [vmem:[%s2054_s1 + $0x1d0] ss:$8 sps:$4 sm:$0xff]  }
  0x40   :  { %930 = vmatpush1.bf16.msra.mxu0 %v1444_v3  ;;  %858 = vmatprep.subr.bf16.mxu1 %v1447_v4  ;;  %v1526_v3 = vld [vmem:[%s2054_s1 + $0x3d0] ss:$8 sps:$4 sm:$0xff]   ;;  %v1531_v4 = vld [vmem:[%s2054_s1 + $0x1e4] ss:$8 sps:$4 sm:$0xff]  }
  0x41   :  { %940 = vmatprep.subr.bf16.mxu0 %v1450_v7  ;;  %v1532_v7 = vld [vmem:[%s2054_s1 + $0x3e0] ss:$8 sps:$4 sm:$0xff]  }
  0x42   :  { %850 = vmatmul.mubr.bf16.vlgmr.msra.gmra.mrb[0].mxu1 %v29_v10  ;;  %v1535_v10 = vld [vmem:[%s2054_s1 + $0x1f0] ss:$8 sps:$4 sm:$0xff]  }
  0x43   :  { %932 = vmatmul.mubr.bf16.vlgmr.msra.gmra.mrb[0].mxu0 %v33_v11  ;;  %859 = vmatpush1.bf16.msra.mxu1 %v1445_v8  ;;  %v1537_v8 = vld [vmem:[%s2054_s1 + $0x1f4] ss:$8 sps:$4 sm:$0xff]   ;;  %v1538_v11 = vld [vmem:[%s2054_s1 + $0x3f0] ss:$8 sps:$4 sm:$0xff]  }
  0x44   :  { %941 = vmatpush1.bf16.msra.mxu0 %v1448_v9  ;;  %860 = vmatprep.subr.bf16.mxu1 %v1453_v12  ;;  %v1540_v9 = vld [vmem:[%s2054_s1 + $0x3f4] ss:$8 sps:$4 sm:$0xff]  }
  0x45   :  { %942 = vmatprep.subr.bf16.mxu0 %v1456_v13  ;;  %890 = vmatprep.mubr.bf16.mxu1 %v32_v37  ;;  %v23_v12 = vld [vmem:[%s2055_s0 + $0x10] sm:$0xff] }
  0x46   :  { %972 = vmatprep.mubr.bf16.mxu0 %v36_v40  ;;  %v27_v13 = vld [vmem:[%s2055_s0 + $0x30] sm:$0xff] }
  0x47   :  { %861 = vmatpush1.bf16.msra.mxu1 %v1451_v14  ;;  %v1541_v14 = vld [vmem:[%s2056_s3 + $0x40] sm:$0xff]  }
  0x48   :  { %943 = vmatpush1.bf16.msra.mxu0 %v1454_v15  ;;  %862 = vmatprep.subr.bf16.mxu1 %v1459_v16  ;;  %v31_v15 = vpack.c.bf16 %v23_v12, %v23_v12  ;;  %v35_v16 = vpack.c.bf16 %v27_v13, %v27_v13 }
  0x49   :  { %944 = vmatprep.subr.bf16.mxu0 %v1462_v17  ;;  %v1542_v17 = vld [vmem:[%s2056_s3] sm:$0xff]  }
  0x4b   :  { %863 = vmatpush1.bf16.msra.mxu1 %v1457_v18  ;;  %v1543_v18 = vld [vmem:[%s2056_s3 + $0x48] sm:$0xff]  }
  0x4c   :  { %945 = vmatpush1.bf16.msra.mxu0 %v1460_v19  ;;  %864 = vmatprep.subr.bf16.mxu1 %v1465_v20  ;;  %v1544_v19 = vld [vmem:[%s2056_s3 + $0x8] sm:$0xff]   ;;  %v1545_v20 = vld [vmem:[%s2056_s3 + $0x50] sm:$0xff]  }
  0x4d   :  { %946 = vmatprep.subr.bf16.mxu0 %v1468_v21  ;;  %v1546_v21 = vld [vmem:[%s2056_s3 + $0x10] sm:$0xff]  }
  0x4f   :  { %865 = vmatpush1.bf16.msra.mxu1 %v1463_v22  ;;  %v1547_v22 = vld [vmem:[%s2056_s3 + $0x58] sm:$0xff]  }
  0x50   :  { %947 = vmatpush1.bf16.msra.mxu0 %v1466_v23  ;;  %866 = vmatprep.subr.bf16.mxu1 %v1471_v24  ;;  %v1548_v23 = vld [vmem:[%s2056_s3 + $0x18] sm:$0xff]   ;;  %v1549_v24 = vld [vmem:[%s2056_s3 + $0x60] sm:$0xff]  }
  0x51   :  { %948 = vmatprep.subr.bf16.mxu0 %v1474_v25  ;;  %v1550_v25 = vld [vmem:[%s2056_s3 + $0x20] sm:$0xff]  }
  0x53   :  { %867 = vmatpush1.bf16.msra.mxu1 %v1469_v26  ;;  %v1551_v26 = vld [vmem:[%s2056_s3 + $0x68] sm:$0xff]  }
  0x54   :  { %949 = vmatpush1.bf16.msra.mxu0 %v1472_v27  ;;  %868 = vmatprep.subr.bf16.mxu1 %v1477_v28  ;;  %v1552_v27 = vld [vmem:[%s2056_s3 + $0x28] sm:$0xff]   ;;  %v1553_v28 = vld [vmem:[%s2056_s3 + $0x70] sm:$0xff]  }
  0x55   :  { %950 = vmatprep.subr.bf16.mxu0 %v1480_v29  ;;  %v1554_v29 = vld [vmem:[%s2056_s3 + $0x30] sm:$0xff]  }
  0x57   :  { %869 = vmatpush1.bf16.msra.mxu1 %v1475_v30  ;;  %v1555_v30 = vld [vmem:[%s2056_s3 + $0x78] sm:$0xff]  }
  0x58   :  { %951 = vmatpush1.bf16.msra.mxu0 %v1478_v31  ;;  %870 = vmatprep.subr.bf16.mxu1 %v1483_v32  ;;  %v1556_v31 = vld [vmem:[%s2056_s3 + $0x38] sm:$0xff]   ;;  %v167_v32 = vlaneseq }
  0x59   :  { %952 = vmatprep.subr.bf16.mxu0 %v1486_v33 }
  0x5a   :  { %v168_v33 = vshrl.u32 %v167_v32, 7 }
  0x5b   :  { %871 = vmatpush1.bf16.msra.mxu1 %v1481_v35  ;;  %v165_v35 = vld [vmem:[%s2057_s2] sm:$0x3] }
  0x5c   :  { %953 = vmatpush1.bf16.msra.mxu0 %v1484_v36  ;;  %872 = vmatprep.subr.bf16.mxu1 %v1489_v39  ;;  %v169_v34 = vsub.s32 0, %v168_v33  ;;  %v173_v36 = vsub.s32 1, %v168_v33 }
  0x5d   :  { %954 = vmatprep.subr.bf16.mxu0 %v1492_v41 }
  0x5e   :  { %v170_v37 = vrot.slane %v165_v35, %v169_v34  ;;  %v174_v38 = vrot.slane %v165_v35, %v173_v36 }
  0x5f   :  { %873 = vmatpush1.bf16.msra.mxu1 %v1487_v42 }
  0x60   :  { %955 = vmatpush1.bf16.msra.mxu0 %v1490_v43  ;;  %874 = vmatprep.subr.bf16.mxu1 %v1495_v44 }
  0x61   :  { %956 = vmatprep.subr.bf16.mxu0 %v1498_v45 }
  0x63   :  { %875 = vmatpush1.bf16.msra.mxu1 %v1493_v46 }
  0x64   :  { %957 = vmatpush1.bf16.msra.mxu0 %v1496_v47  ;;  %876 = vmatprep.subr.bf16.mxu1 %v1501_v48 }
  0x65   :  { %958 = vmatprep.subr.bf16.mxu0 %v1504_v49 }
  0x67   :  { %877 = vmatpush1.bf16.msra.mxu1 %v1499_v50 }
  0x68   :  { %959 = vmatpush1.bf16.msra.mxu0 %v1502_v51  ;;  %878 = vmatprep.subr.bf16.mxu1 %v1507_v52 }
  0x69   :  { %960 = vmatprep.subr.bf16.mxu0 %v1510_v53 }
  0x6b   :  { %879 = vmatpush1.bf16.msra.mxu1 %v1505_v54 }
  0x6c   :  { %961 = vmatpush1.bf16.msra.mxu0 %v1508_v55  ;;  %880 = vmatprep.subr.bf16.mxu1 %v1513_v56 }
  0x6d   :  { %962 = vmatprep.subr.bf16.mxu0 %v1516_v57  ;;  %v1298_v57 = vld [vmem:[%s2058_s4] ss:$0 sm:$0xff] }
  0x6f   :  { %881 = vmatpush1.bf16.msra.mxu1 %v1511_v58 }
  0x70   :  { %963 = vmatpush1.bf16.msra.mxu0 %v1514_v59  ;;  %882 = vmatprep.subr.bf16.mxu1 %v1519_v60 }
  0x71   :  { %964 = vmatprep.subr.bf16.mxu0 %v1522_v61 }
  0x73   :  { %883 = vmatpush1.bf16.msra.mxu1 %v1517_v62 }
  0x74   :  { %965 = vmatpush1.bf16.msra.mxu0 %v1520_v63  ;;  %884 = vmatprep.subr.bf16.mxu1 %v1525_v0 }
  0x75   :  { %966 = vmatprep.subr.bf16.mxu0 %v1528_v1 }
  0x77   :  { %885 = vmatpush1.bf16.msra.mxu1 %v1523_v2 }
  0x78   :  { %967 = vmatpush1.bf16.msra.mxu0 %v1526_v3  ;;  %886 = vmatprep.subr.bf16.mxu1 %v1531_v4 }
  0x79   :  { %968 = vmatprep.subr.bf16.mxu0 %v1534_v5 }
  0x7b   :  { %887 = vmatpush1.bf16.msra.mxu1 %v1529_v6 }
  0x7c   :  { %969 = vmatpush1.bf16.msra.mxu0 %v1532_v7  ;;  %888 = vmatprep.subr.bf16.mxu1 %v1537_v8 }
  0x7d   :  { %970 = vmatprep.subr.bf16.mxu0 %v1540_v9 }
  0x7f   :  { %889 = vmatpush1.bf16.msra.mxu1 %v1535_v10 }
  0x80   :  { %971 = vmatpush1.bf16.msra.mxu0 %v1538_v11  ;;  %1315 = vmatprep.subr.bf16.mxu1 %v1541_v14 }
  0x82   :  { %891 = vmatmul.mubr.bf16.vlgmr.msra.gmra.mrb[0].mxu1 %v31_v15 }
  0x83   :  { %973 = vmatmul.mubr.bf16.vlgmr.msra.gmra.mrb[0].mxu0 %v35_v16  ;;  %1316 = vmatpush3.bf16.msra.mxu1 %v1542_v17 }
  0x84   :  { %1317 = vmatprep.subr.bf16.mxu1 %v1543_v18 }
  0x87   :  { %1318 = vmatpush3.bf16.msra.mxu1 %v1544_v19 }
  0x88   :  { %1319 = vmatprep.subr.bf16.mxu1 %v1545_v20 }
  0x8b   :  { %1320 = vmatpush3.bf16.msra.mxu1 %v1546_v21 }
  0x8c   :  { %1321 = vmatprep.subr.bf16.mxu1 %v1547_v22 }
  0x8f   :  { %1322 = vmatpush3.bf16.msra.mxu1 %v1548_v23 }
  0x90   :  { %1323 = vmatprep.subr.bf16.mxu1 %v1549_v24 }
  0x93   :  { %1324 = vmatpush3.bf16.msra.mxu1 %v1550_v25 }
  0x94   :  { %1325 = vmatprep.subr.bf16.mxu1 %v1551_v26 }
  0x97   :  { %1326 = vmatpush3.bf16.msra.mxu1 %v1552_v27 }
  0x98   :  { %1327 = vmatprep.subr.bf16.mxu1 %v1553_v28 }
  0x9b   :  { %1328 = vmatpush3.bf16.msra.mxu1 %v1554_v29 }
  0x9c   :  { %1329 = vmatprep.subr.bf16.mxu1 %v1555_v30 }
  0x9f   :  { %1330 = vmatpush3.bf16.msra.mxu1 %v1556_v31 }
 0x155   :  { %v892_v39 = vpop.f32.mrb[0].mxu1 }
 0x156   :  { %v974_v40 = vpop.f32.mrb[0].mxu0  ;;  %v1337_v41 = vadd.f32 %v892_v39, %v170_v37  ;;  %v894_v42 = vpop.f32.mrb[1].mxu1 }
 0x157   :  { %v976_v43 = vpop.f32.mrb[1].mxu0  ;;  %v1339_v44 = vadd.f32 %v894_v42, %v174_v38  ;;  %v896_v45 = vpop.f32.mrb[2].mxu1 }
 0x158   :  { %v978_v46 = vpop.f32.mrb[2].mxu0  ;;  %v1338_v47 = vadd.f32 %v1337_v41, %v974_v40  ;;  %v897_v48 = vpop.f32.mrb[3].mxu1 }
 0x159   :  { %v979_v49 = vpop.f32.mrb[3].mxu0  ;;  %v1340_v50 = vadd.f32 %v1339_v44, %v976_v43 }
 0x15a   :  { %v981_v51 = vmax.f32 %v1338_v47, 0.0 }
 0x15b   :  { %v982_v52 = vmax.f32 %v1340_v50, 0.0 }
 0x15c   :  { %v983_v54 = vpack.c.bf16 %v981_v51, %v981_v51 }
 0x15d   :  { %v984_v53 = vpack.c.bf16 %v982_v52, %v982_v52 }
 0x15f   :  { %1152 = vmatprep.mubr.bf16.mxu1 %v984_v53 }
 0x160   :  { %1153 = vmatmul.mubr.bf16.vlgmr.msra.gmra.mrb[4].mxu1 %v983_v54 }
 0x233   :  { %v1331_v55 = vpop.f32.mrb[4].mxu1 }
 0x234   :  { %v1332_v56 = vpop.f32.mrb[5].mxu1 }
 0x235   :  { %v1333_v58 = vadd.f32 %v1332_v56, %v1331_v55  ;;  %v1334_v59 = vpop.f32.mrb[6].mxu1 }
 0x236   :  { %v1335_v60 = vpop.f32.mrb[7].mxu1 }
 0x237   :  { %v1155_v61 = vadd.f32 %v1333_v58, %v1298_v57 }
 0x239   :  { %v1160_v62 = vmul.f32 %v1155_v61, %v1155_v61 }
 0x23b   :  { %1161 = vadd.xlane.f32.xlu0 %v1160_v62 }
 0x2c8   :  { %v1162_v63 = vpop.xlane.xlu0 %1161 }
 0x2c9   :  { %1557 = vrsqrt.f32 %v1162_v63 }
 0x2d3   :  { %v1558_v0 = vpop.eup %1557 }
 0x2d4   :  { %v1164_v1 = vmul.f32 %v1558_v0, %v1155_v61 }
 0x2d6   :  { %1165 = vst [vmem:[%s2059_s5] sm:$0xff] %v1164_v1 }

</bundles_post_ra>
